<compile_context>
chip_gen: v7x
topology: tpu7x:2x2x1
jax: 0.10.0
libtpu: 0.0.40
codegen_flags: <defaults>
</compile_context>

<pallas_src>
import jax
import jax.numpy as jnp
from jax.experimental import pallas as pl
from jax.experimental.pallas import tpu as pltpu


def mlp_kernel(x_ref, w0_ref, b0_ref, w1_ref, b1_ref, w2_ref, b2_ref, o_ref):
    # Single grid point; everything resident in VMEM, three fused MXU matmuls.
    z0 = x_ref[...]                                                     # (1, d0p)
    s1 = jnp.dot(z0, w0_ref[...],
                 preferred_element_type=jnp.float32) + b0_ref[...]      # (1, d1p)
    z1 = jnp.maximum(s1, 0.0)                                           # relu
    s2 = jnp.dot(z1, w1_ref[...],
                 preferred_element_type=jnp.float32) + b1_ref[...]      # (1, d2p)
    z2 = jnp.maximum(s2, 0.0)                                           # relu
    s3 = jnp.dot(z2, w2_ref[...],
                 preferred_element_type=jnp.float32) + b2_ref[...]      # (1, d3p)
    o_ref[...] = s3.astype(o_ref.dtype)


def _round_up(n, m):
    return (n + m - 1) // m * m


def prepare_params(params, weight_dtype=jnp.float32):
    """One-time preprocessing (do NOT call per forward).

    Transposes PyTorch-layout (d_out, d_in) weights to (d_in, d_out) and
    zero-pads every dim up to a multiple of 128 so the kernel sees
    lane-dense, MXU-aligned operands.  Zero padding preserves numerics
    exactly (padded inputs x padded rows contribute 0; padded ReLU columns
    stay 0; padded output columns are 0 and sliced away in the wrapper).
    """
    prepped = []
    for w, b in params:
        d_out, d_in = w.shape
        d_in_p = _round_up(d_in, 128)
        d_out_p = _round_up(d_out, 128)
        wt = jnp.zeros((d_in_p, d_out_p), weight_dtype)
        wt = wt.at[:d_in, :d_out].set(w.T.astype(weight_dtype))
        br = jnp.zeros((1, d_out_p), jnp.float32).at[0, :d_out].set(b)
        prepped.append((wt, br))
    return prepped


def mynet_forward(x, prepped_params, out_dim):
    """x: (C, H, W) float32 image.  prepped_params: output of prepare_params.
    Returns (out_dim,) float32, matching the PyTorch module."""
    (w0t, b0), (w1t, b1), (w2t, b2) = prepped_params
    d0p, d1p = w0t.shape
    d2p = w1t.shape[1]
    d3p = w2t.shape[1]

    # Flatten and zero-pad the image row to the 128-aligned d0p (tiny: ~2.5 KB).
    flat = x.reshape(-1).astype(jnp.float32)
    z0 = jnp.pad(flat, (0, d0p - flat.shape[0])).reshape(1, d0p)

    full = lambda shape: pl.BlockSpec(shape, lambda: (0,) * len(shape),
                                      memory_space=pltpu.VMEM)

    flops = 2 * (d0p * d1p + d1p * d2p + d2p * d3p)
    bytes_accessed = 4 * (d0p + d1p + d2p + 2 * d3p) \
        + w0t.size * w0t.dtype.itemsize \
        + w1t.size * w1t.dtype.itemsize \
        + w2t.size * w2t.dtype.itemsize

    out = pl.pallas_call(
        mlp_kernel,
        out_shape=jax.ShapeDtypeStruct((1, d3p), jnp.float32),
        in_specs=[
            full((1, d0p)),
            full((d0p, d1p)), full((1, d1p)),
            full((d1p, d2p)), full((1, d2p)),
            full((d2p, d3p)), full((1, d3p)),
        ],
        out_specs=full((1, d3p)),
        cost_estimate=pl.CostEstimate(flops=flops, transcendentals=0,
                                      bytes_accessed=bytes_accessed),
    )(z0, w0t, b0, w1t, b1, w2t, b2)
    return out[0, :out_dim]


def init_params(key, d0, d1, d2, d3):
    """Deterministic init mimicking nn.Linear's uniform(-1/sqrt(fan_in), 1/sqrt(fan_in)).
    Stored in PyTorch layout (d_out, d_in) like the reference module."""
    params = []
    dims = [(d0, d1), (d1, d2), (d2, d3)]
    for (fan_in, fan_out) in dims:
        key, kw, kb = jax.random.split(key, 3)
        bound = 1.0 / (fan_in ** 0.5)
        w = jax.random.uniform(kw, (fan_out, fan_in), jnp.float32, -bound, bound)
        b = jax.random.uniform(kb, (fan_out,), jnp.float32, -bound, bound)
        params.append((w, b))
    return params


def reference_forward(x, params):
    (w0, b0), (w1, b1), (w2, b2) = params
    z0 = x.reshape(-1)
    s1 = z0 @ w0.T + b0
    z1 = jnp.maximum(s1, 0.0)
    s2 = z1 @ w1.T + b1
    z2 = jnp.maximum(s2, 0.0)
    return z2 @ w2.T + b2


if __name__ == "__main__":
    # Image shape from the module preamble: torch.randn(3, 10, 20) -> d0 = 600.
    C, H, W = 3, 10, 20
    d0 = C * H * W
    d1, d2, d3 = 128, 64, 10

    key = jax.random.PRNGKey(0)
    key, kx = jax.random.split(key)
    x = jax.random.normal(kx, (C, H, W), dtype=jnp.float32)
    params = init_params(key, d0, d1, d2, d3)

    # One-time weight prep (transpose + pad) -- stays OUT of the hot path.
    prepped = prepare_params(params)

    out = mynet_forward(x, prepped, d3)
    out = jax.block_until_ready(out)

    ref = reference_forward(x, params)
    assert out.shape == (d3,)
    assert jnp.allclose(out, ref, atol=1e-4, rtol=1e-4), "mismatch vs pure-JAX reference"

    print("KERNEL_OK")
</pallas_src>

<mosaic_0001>
module attributes {stable_mosaic.version = 11 : i64} {
  func.func @mlp_kernel(%arg0: memref<1x640xf32, #tpu.memory_space<vmem>>, %arg1: memref<640x128xf32, #tpu.memory_space<vmem>>, %arg2: memref<1x128xf32, #tpu.memory_space<vmem>>, %arg3: memref<128x128xf32, #tpu.memory_space<vmem>>, %arg4: memref<1x128xf32, #tpu.memory_space<vmem>>, %arg5: memref<128x128xf32, #tpu.memory_space<vmem>>, %arg6: memref<1x128xf32, #tpu.memory_space<vmem>>, %arg7: memref<1x128xf32, #tpu.memory_space<vmem>>) attributes {dimension_semantics = [], scalar_prefetch = 0 : i64, scratch_operands = 0 : i64, tpu.core_type = #tpu.core_type<tc>} {
    %c0 = arith.constant 0 : index
    %c0_0 = arith.constant 0 : index
    %0 = vector.load %arg0[%c0, %c0_0] : memref<1x640xf32, #tpu.memory_space<vmem>>, vector<1x640xf32>
    %c0_1 = arith.constant 0 : index
    %c0_2 = arith.constant 0 : index
    %1 = vector.load %arg1[%c0_1, %c0_2] : memref<640x128xf32, #tpu.memory_space<vmem>>, vector<640x128xf32>
    %cst = arith.constant dense<0.000000e+00> : vector<1x128xf32>
    %2 = tpu.matmul %0, %1, %cst {dimension_numbers = #tpu.dot_dimension_numbers<[1], [0], [0], [1], [0, 0, 1, 1], [], []>} : vector<1x640xf32>, vector<640x128xf32>, vector<1x128xf32> -> vector<1x128xf32>
    %c0_3 = arith.constant 0 : index
    %c0_4 = arith.constant 0 : index
    %3 = vector.load %arg2[%c0_3, %c0_4] : memref<1x128xf32, #tpu.memory_space<vmem>>, vector<1x128xf32>
    %4 = arith.addf %2, %3 : vector<1x128xf32>
    %cst_5 = arith.constant 0.000000e+00 : f32
    %5 = vector.broadcast %cst_5 : f32 to vector<1x128xf32>
    %6 = arith.maximumf %4, %5 : vector<1x128xf32>
    %c0_6 = arith.constant 0 : index
    %c0_7 = arith.constant 0 : index
    %7 = vector.load %arg3[%c0_6, %c0_7] : memref<128x128xf32, #tpu.memory_space<vmem>>, vector<128x128xf32>
    %cst_8 = arith.constant dense<0.000000e+00> : vector<1x128xf32>
    %8 = tpu.matmul %6, %7, %cst_8 {dimension_numbers = #tpu.dot_dimension_numbers<[1], [0], [0], [1], [0, 0, 1, 1], [], []>} : vector<1x128xf32>, vector<128x128xf32>, vector<1x128xf32> -> vector<1x128xf32>
    %c0_9 = arith.constant 0 : index
    %c0_10 = arith.constant 0 : index
    %9 = vector.load %arg4[%c0_9, %c0_10] : memref<1x128xf32, #tpu.memory_space<vmem>>, vector<1x128xf32>
    %10 = arith.addf %8, %9 : vector<1x128xf32>
    %cst_11 = arith.constant 0.000000e+00 : f32
    %11 = vector.broadcast %cst_11 : f32 to vector<1x128xf32>
    %12 = arith.maximumf %10, %11 : vector<1x128xf32>
    %c0_12 = arith.constant 0 : index
    %c0_13 = arith.constant 0 : index
    %13 = vector.load %arg5[%c0_12, %c0_13] : memref<128x128xf32, #tpu.memory_space<vmem>>, vector<128x128xf32>
    %cst_14 = arith.constant dense<0.000000e+00> : vector<1x128xf32>
    %14 = tpu.matmul %12, %13, %cst_14 {dimension_numbers = #tpu.dot_dimension_numbers<[1], [0], [0], [1], [0, 0, 1, 1], [], []>} : vector<1x128xf32>, vector<128x128xf32>, vector<1x128xf32> -> vector<1x128xf32>
    %c0_15 = arith.constant 0 : index
    %c0_16 = arith.constant 0 : index
    %15 = vector.load %arg6[%c0_15, %c0_16] : memref<1x128xf32, #tpu.memory_space<vmem>>, vector<1x128xf32>
    %16 = arith.addf %14, %15 : vector<1x128xf32>
    %c0_17 = arith.constant 0 : index
    %c0_18 = arith.constant 0 : index
    %17 = vector.load %arg7[%c0_17, %c0_18] : memref<1x128xf32, #tpu.memory_space<vmem>>, vector<1x128xf32>
    tpu.vector_store %arg7[%c0_17, %c0_18], %16 {strides = array<i32>} : memref<1x128xf32, #tpu.memory_space<vmem>>, vector<1x128xf32>,
    return
  }
}

</mosaic_0001>

<bundles_post_ra>
// kernel: tpu_custom_call.1
= control target key start
LH: loop header
LB: loop body
LE: loop exit
PB: predicated region body
PF: predicated region fallthrough
CT: control target
= control target key end

     0   :  { %12 = vsyncpa [#allocation3], 0  ;;  %s1251_s0 = inlined_call_operand.hbm [shape: f32[1,640], index: 0, kind: input, shape index: {}]   ;;  %s1252_s1 = inlined_call_operand.hbm [shape: f32[640,128], index: 1, kind: input, shape index: {}]   ;;  %s1253_s2 = inlined_call_operand.vmem [shape: f32[1,128], index: 2, kind: input, shape index: {}]   ;;  %s1254_s3 = inlined_call_operand.hbm [shape: f32[128,128], index: 3, kind: input, shape index: {}]   ;;  %s1255_s4 = inlined_call_operand.vmem [shape: f32[1,128], index: 4, kind: input, shape index: {}]   ;;  %s1256_s5 = inlined_call_operand.hbm [shape: f32[128,128], index: 5, kind: input, shape index: {}]   ;;  %s1257_s6 = inlined_call_operand.vmem [shape: f32[1,128], index: 6, kind: input, shape index: {}]   ;;  %s1258_s7 = inlined_call_operand.hbm [shape: f32[1,128], index: 7, kind: output, shape index: {}]  }
   0x1   :  { %13 = vsyncpa [#allocation6], 0 }
   0x2   :  { %14 = vsyncpa [#allocation9], 0 }
   0x3   :  { %15 = vsyncpa [#allocation4], 0  ;;  %s1082_s24 = smov [#allocation5]   ;;  %s964_s28 = scalar_lea.hbm %s1252_s1, 10240 }
   0x4   :  { %s31_s25 = sshll.u32 %s1082_s24, 4  ;;  %p965_p0 = scmp.ne.s32.totalorder %s1252_s1, %s964_s28  ;;  %s32_s25 = int_to_ptr.vmem [resolvable:$true] %s31_s25 }
   0x5   :  { %p968_p1 = scmp.lt.u32.totalorder %s964_s28, %s1252_s1 }
   0x7   :  { %p970_p2 = pnand %p968_p1, %p965_p0 }
   0x9   :  { %973 = shalt.err (!%p970_p2)
}
   0xa   :  { %s974_s10 = scalar_lea.vmem %s32_s25, 10240  ;;  %p979_p4 = scmp.lt.s32.totalorder %s32_s25, %s32_s25 }
   0xb   :  { %p975_p3 = scmp.ne.s32.totalorder %s32_s25, %s974_s10  ;;  %p980_p5 = scmp.lt.s32.totalorder %s974_s10, %s974_s10 }
   0xd   :  { %p981_p6 = por %p980_p5, %p979_p4 }
   0xf   :  { %p982_p7 = pnand %p981_p6, %p975_p3 }
  0x11   :  { %985 = shalt.err (!%p982_p7)
}
  0x12   :  { %s1083_s11 = smov 128   ;;  %s1084_s12 = smov 8  }
  0x13   :  { %37 = dma.hbm_to_vmem [thread:$0]  %s1252_s1, 10240, %s32_s25, [#allocation6], %s1083_s11, %s1083_s11, %s1084_s12  }
  0x14   :  { %s1085_s15 = smov [#allocation2]   ;;  %s1086_s17 = smov [#allocation7]  }
  0x15   :  { %s22_s16 = sshll.u32 %s1085_s15, 4  ;;  %s45_s18 = sshll.u32 %s1086_s17, 4  ;;  %s23_s16 = int_to_ptr.vmem [resolvable:$true] %s22_s16  ;;  %s46_s18 = int_to_ptr.vmem [resolvable:$true] %s45_s18 }
  0x16   :  { %s986_s21 = scalar_lea.hbm %s1251_s0, 80 }
  0x17   :  { %p987_p8 = scmp.ne.s32.totalorder %s1251_s0, %s986_s21  ;;  %p990_p9 = scmp.lt.u32.totalorder %s986_s21, %s1251_s0 }
  0x19   :  { %p992_p10 = pnand %p990_p9, %p987_p8 }
  0x1b   :  { %995 = shalt.err (!%p992_p10)
}
  0x1c   :  { %s996_s1 = scalar_lea.vmem %s23_s16, 80  ;;  %s1000_s25 = scalar_lea.vmem %s23_s16, 96 }
  0x1d   :  { %p997_p11 = scmp.ne.s32.totalorder %s23_s16, %s996_s1  ;;  %p1001_p12 = scmp.lt.s32.totalorder %s23_s16, %s23_s16 }
  0x1e   :  { %p1002_p13 = scmp.lt.s32.totalorder %s1000_s25, %s996_s1 }
  0x20   :  { %p1003_p0 = por %p1002_p13, %p1001_p12 }
  0x22   :  { %p1004_p1 = pnand %p1003_p0, %p997_p11 }
  0x24   :  { %1007 = shalt.err (!%p1004_p1)
}
  0x25   :  { %25 = dma.hbm_to_vmem [thread:$0]  %s1251_s0, 80, %s23_s16, [#allocation3]  }
  0x26   :  { %s1008_s8 = scalar_lea.hbm %s1254_s3, 2048 }
  0x27   :  { %p1009_p2 = scmp.ne.s32.totalorder %s1254_s3, %s1008_s8  ;;  %p1012_p3 = scmp.lt.u32.totalorder %s1008_s8, %s1254_s3 }
  0x29   :  { %p1014_p4 = pnand %p1012_p3, %p1009_p2 }
  0x2b   :  { %1017 = shalt.err (!%p1014_p4)
}
  0x2c   :  { %s1018_s15 = scalar_lea.vmem %s46_s18, 2048  ;;  %p1023_p6 = scmp.lt.s32.totalorder %s46_s18, %s46_s18 }
  0x2d   :  { %p1019_p5 = scmp.ne.s32.totalorder %s46_s18, %s1018_s15  ;;  %p1024_p7 = scmp.lt.s32.totalorder %s1018_s15, %s1018_s15 }
  0x2f   :  { %p1025_p8 = por %p1024_p7, %p1023_p6 }
  0x31   :  { %p1026_p9 = pnand %p1025_p8, %p1019_p5 }
  0x33   :  { %1029 = shalt.err (!%p1026_p9)
}
  0x34   :  { %51 = dma.hbm_to_vmem [thread:$0]  %s1254_s3, 2048, %s46_s18, [#allocation6], %s1083_s11, %s1083_s11, %s1084_s12  }
  0x35   :  { %s1087_s17 = smov [#allocation8]   ;;  %s1030_s22 = scalar_lea.hbm %s1256_s5, 2048 }
  0x36   :  { %s59_s19 = sshll.u32 %s1087_s17, 4  ;;  %p1031_p10 = scmp.ne.s32.totalorder %s1256_s5, %s1030_s22  ;;  %s60_s19 = int_to_ptr.vmem [resolvable:$true] %s59_s19 }
  0x37   :  { %p1034_p11 = scmp.lt.u32.totalorder %s1030_s22, %s1256_s5 }
  0x39   :  { %p1036_p12 = pnand %p1034_p11, %p1031_p10 }
  0x3b   :  { %1039 = shalt.err (!%p1036_p12)
}
  0x3c   :  { %s1040_s25 = scalar_lea.vmem %s60_s19, 2048  ;;  %p1045_p0 = scmp.lt.s32.totalorder %s60_s19, %s60_s19 }
  0x3d   :  { %p1041_p13 = scmp.ne.s32.totalorder %s60_s19, %s1040_s25  ;;  %p1046_p1 = scmp.lt.s32.totalorder %s1040_s25, %s1040_s25 }
  0x3f   :  { %p1047_p2 = por %p1046_p1, %p1045_p0 }
  0x41   :  { %p1048_p3 = pnand %p1047_p2, %p1041_p13 }
  0x43   :  { %1051 = shalt.err (!%p1048_p3)
}
  0x44   :  { %65 = dma.hbm_to_vmem [thread:$0]  %s1256_s5, 2048, %s60_s19, [#allocation9], %s1083_s11, %s1083_s11, %s1084_s12  }
  0x45   :  { %1074 = dma.done.wait [#allocation3], 80  }
  0x46   :  { %1075 = vsyncadd [#allocation3], 4294967216 }
  0x47   :  { %1076 = dma.done.wait [#allocation6], 12288  }
  0x48   :  { %1077 = vsyncadd [#allocation6], 4294955008 }
  0x49   :  { %1078 = dma.done.wait [#allocation9], 2048  }
  0x4a   :  { %1079 = vsyncadd [#allocation9], 4294965248  ;;  %v97_v0 = vld [vmem:[#allocation5 + $0x80] sm:$0xff]  ;;  %v98_v1 = vld [vmem:[#allocation5 + $0x88] sm:$0xff]  ;;  %v163_v43 = vlaneseq  ;;  %vm1089_vm0 = vmmov 0   ;;  %s1091_s29 = smov [#allocation10]  }
  0x4b   :  { %v81_v2 = vld [vmem:[#allocation5] sm:$0xff]  ;;  %v818_v3 = vpack.c.bf16 %v98_v1, %v97_v0  ;;  %v82_v4 = vld [vmem:[#allocation5 + $0x8] sm:$0xff]  ;;  %v99_v11 = vld [vmem:[#allocation5 + $0x90] sm:$0xff]  ;;  %s581_s30 = sshll.u32 %s1091_s29, 4  ;;  %s582_s30 = int_to_ptr.vmem [resolvable:$true] %s581_s30 }
  0x4c   :  { %v129_v5 = vld [vmem:[#allocation5 + $0x180] sm:$0xff]  ;;  %v130_v6 = vld [vmem:[#allocation5 + $0x188] sm:$0xff]  ;;  %v820_v7 = vpack.c.bf16 %v82_v4, %v81_v2  ;;  %v100_v13 = vld [vmem:[#allocation5 + $0x98] sm:$0xff]  ;;  %v1189_v57 = vshrl.u32 %v163_v43, 7  ;;  %s1052_s8 = scalar_lea.vmem %s582_s30, 16  ;;  %s1056_s9 = scalar_lea.vmem %s582_s30, 32 }
  0x4d   :  { %v850_v8 = vpack.c.bf16 %v130_v6, %v129_v5  ;;  %v113_v9 = vld [vmem:[#allocation5 + $0x100] sm:$0xff]  ;;  %v114_v10 = vld [vmem:[#allocation5 + $0x108] sm:$0xff]  ;;  %819 = vmatprep.subr.bf16.mxu0 %v818_v3  ;;  %v83_v14 = vld [vmem:[#allocation5 + $0x10] sm:$0xff]  ;;  %v822_v16 = vpack.c.bf16 %v100_v13, %v99_v11  ;;  %p1053_p4 = scmp.ne.s32.totalorder %s582_s30, %s1052_s8  ;;  %p1057_p5 = scmp.lt.s32.totalorder %s582_s30, %s582_s30 }
  0x4e   :  { %v852_v12 = vpack.c.bf16 %v114_v10, %v113_v9  ;;  %v84_v15 = vld [vmem:[#allocation5 + $0x18] sm:$0xff]  ;;  %821 = vmatpush3.bf16.msra.mxu0 %v820_v7  ;;  %v131_v18 = vld [vmem:[#allocation5 + $0x190] sm:$0xff]  ;;  %v101_v23 = vld [vmem:[#allocation5 + $0xa0] sm:$0xff]  ;;  %v169_v6 = vsub.s32 1, %v1189_v57  ;;  %v177_v11 = vsub.s32 3, %v1189_v57  ;;  %p1058_p6 = scmp.lt.s32.totalorder %s1056_s9, %s1052_s8 }
  0x4f   :  { %851 = vmatprep.subr.bf16.mxu1 %v850_v8  ;;  %v824_v17 = vpack.c.bf16 %v84_v15, %v83_v14  ;;  %v132_v19 = vld [vmem:[#allocation5 + $0x198] sm:$0xff]  ;;  %v115_v20 = vld [vmem:[#allocation5 + $0x110] sm:$0xff]  ;;  %v102_v24 = vld [vmem:[#allocation5 + $0xa8] sm:$0xff]  ;;  %823 = vmatprep.subr.bf16.mxu0 %v822_v16 }
  0x50   :  { %853 = vmatpush3.bf16.msra.mxu1 %v852_v12  ;;  %v854_v21 = vpack.c.bf16 %v132_v19, %v131_v18  ;;  %v116_v22 = vld [vmem:[#allocation5 + $0x118] sm:$0xff]  ;;  %v826_v26 = vpack.c.bf16 %v102_v24, %v101_v23  ;;  %v85_v27 = vld [vmem:[#allocation5 + $0x20] sm:$0xff]  ;;  %v86_v28 = vld [vmem:[#allocation5 + $0x28] sm:$0xff]  ;;  %p1059_p7 = por %p1058_p6, %p1057_p5 }
  0x51   :  { %v856_v25 = vpack.c.bf16 %v116_v22, %v115_v20  ;;  %v133_v29 = vld [vmem:[#allocation5 + $0x1a0] sm:$0xff]  ;;  %v134_v30 = vld [vmem:[#allocation5 + $0x1a8] sm:$0xff]  ;;  %v828_v33 = vpack.c.bf16 %v86_v28, %v85_v27  ;;  %v103_v35 = vld [vmem:[#allocation5 + $0xb0] sm:$0xff] }
  0x52   :  { %855 = vmatprep.subr.bf16.mxu1 %v854_v21  ;;  %v117_v31 = vld [vmem:[#allocation5 + $0x120] sm:$0xff]  ;;  %v118_v32 = vld [vmem:[#allocation5 + $0x128] sm:$0xff]  ;;  %825 = vmatpush3.bf16.msra.mxu0 %v824_v17  ;;  %v858_v34 = vpack.c.bf16 %v134_v30, %v133_v29  ;;  %v104_v36 = vld [vmem:[#allocation5 + $0xb8] sm:$0xff]  ;;  %p1060_p8 = pnand %p1059_p7, %p1053_p4 }
  0x53   :  { %v87_v37 = vld [vmem:[#allocation5 + $0x30] sm:$0xff]  ;;  %827 = vmatprep.subr.bf16.mxu0 %v826_v26  ;;  %v860_v38 = vpack.c.bf16 %v118_v32, %v117_v31  ;;  %v830_v39 = vpack.c.bf16 %v104_v36, %v103_v35  ;;  %v88_v40 = vld [vmem:[#allocation5 + $0x38] sm:$0xff]  ;;  %v105_v47 = vld [vmem:[#allocation5 + $0xc0] sm:$0xff] }
  0x54   :  { %857 = vmatpush3.bf16.msra.mxu1 %v856_v25  ;;  %v135_v41 = vld [vmem:[#allocation5 + $0x1b0] sm:$0xff]  ;;  %v136_v42 = vld [vmem:[#allocation5 + $0x1b8] sm:$0xff]  ;;  %v106_v48 = vld [vmem:[#allocation5 + $0xc8] sm:$0xff]  ;;  %v832_v49 = vpack.c.bf16 %v88_v40, %v87_v37  ;;  %v165_v37 = vsub.s32 0, %v1189_v57 }
  0x55   :  { %859 = vmatprep.subr.bf16.mxu1 %v858_v34  ;;  %v862_v44 = vpack.c.bf16 %v136_v42, %v135_v41  ;;  %v119_v45 = vld [vmem:[#allocation5 + $0x130] sm:$0xff]  ;;  %v120_v46 = vld [vmem:[#allocation5 + $0x138] sm:$0xff]  ;;  %v137_v50 = vld [vmem:[#allocation5 + $0x1c0] sm:$0xff]  ;;  %v834_v53 = vpack.c.bf16 %v106_v48, %v105_v47 }
  0x56   :  { %829 = vmatpush3.bf16.msra.mxu0 %v828_v33  ;;  %v138_v51 = vld [vmem:[#allocation5 + $0x1c8] sm:$0xff]  ;;  %v864_v52 = vpack.c.bf16 %v120_v46, %v119_v45  ;;  %v89_v54 = vld [vmem:[#allocation5 + $0x40] sm:$0xff]  ;;  %v107_v60 = vld [vmem:[#allocation5 + $0xd0] sm:$0xff]  ;;  %v1088_v46 = vmov 0.0|0.0  }
  0x57   :  { %831 = vmatprep.subr.bf16.mxu0 %v830_v39  ;;  %v90_v55 = vld [vmem:[#allocation5 + $0x48] sm:$0xff]  ;;  %v121_v56 = vld [vmem:[#allocation5 + $0x140] sm:$0xff]  ;;  %v866_v58 = vpack.c.bf16 %v138_v51, %v137_v50  ;;  %v108_v61 = vld [vmem:[#allocation5 + $0xd8] sm:$0xff]  ;;  %v173_v39 = vsub.s32 2, %v1189_v57 }
  0x58   :  { %861 = vmatpush3.bf16.msra.mxu1 %v860_v38  ;;  %v122_v59 = vld [vmem:[#allocation5 + $0x148] sm:$0xff]  ;;  %v139_v62 = vld [vmem:[#allocation5 + $0x1d0] sm:$0xff]  ;;  %v140_v63 = vld [vmem:[#allocation5 + $0x1d8] sm:$0xff]  ;;  %v836_v0 = vpack.c.bf16 %v90_v55, %v89_v54  ;;  %v838_v2 = vpack.c.bf16 %v108_v61, %v107_v60 }
  0x59   :  { %863 = vmatprep.subr.bf16.mxu1 %v862_v44  ;;  %v868_v1 = vpack.c.bf16 %v122_v59, %v121_v56  ;;  %v91_v3 = vld [vmem:[#allocation5 + $0x50] sm:$0xff]  ;;  %v92_v4 = vld [vmem:[#allocation5 + $0x58] sm:$0xff]  ;;  %v870_v7 = vpack.c.bf16 %v140_v63, %v139_v62  ;;  %v109_v9 = vld [vmem:[#allocation5 + $0xe0] sm:$0xff] }
  0x5a   :  { %833 = vmatpush3.bf16.msra.mxu0 %v832_v49  ;;  %v123_v5 = vld [vmem:[#allocation5 + $0x150] sm:$0xff]  ;;  %v124_v8 = vld [vmem:[#allocation5 + $0x158] sm:$0xff]  ;;  %v110_v10 = vld [vmem:[#allocation5 + $0xe8] sm:$0xff]  ;;  %v840_v14 = vpack.c.bf16 %v92_v4, %v91_v3 }
  0x5b   :  { %835 = vmatprep.subr.bf16.mxu0 %v834_v53  ;;  %v141_v12 = vld [vmem:[#allocation5 + $0x1e0] sm:$0xff]  ;;  %v142_v13 = vld [vmem:[#allocation5 + $0x1e8] sm:$0xff]  ;;  %v1193_v15 = vld [vmem:[#allocation2] sm:$0x1f]  ;;  %v872_v16 = vpack.c.bf16 %v124_v8, %v123_v5  ;;  %v842_v17 = vpack.c.bf16 %v110_v10, %v109_v9  ;;  %v181_v5 = vsub.s32 4, %v1189_v57 }
  0x5c   :  { %865 = vmatpush3.bf16.msra.mxu1 %v864_v52  ;;  %v93_v18 = vld [vmem:[#allocation5 + $0x60] sm:$0xff]  ;;  %v94_v19 = vld [vmem:[#allocation5 + $0x68] sm:$0xff]  ;;  %v170_v21 = vrot.slane %v1193_v15, %v169_v6  ;;  %v874_v22 = vpack.c.bf16 %v142_v13, %v141_v12  ;;  %v111_v24 = vld [vmem:[#allocation5 + $0xf0] sm:$0xff]  ;;  %v178_v26 = vrot.slane %v1193_v15, %v177_v11  ;;  %v166_v43 = vrot.slane %v1193_v15, %v165_v37 }
  0x5d   :  { %867 = vmatprep.subr.bf16.mxu1 %v866_v58  ;;  %v125_v20 = vld [vmem:[#allocation5 + $0x160] sm:$0xff]  ;;  %v126_v23 = vld [vmem:[#allocation5 + $0x168] sm:$0xff]  ;;  %v112_v25 = vld [vmem:[#allocation5 + $0xf8] sm:$0xff]  ;;  %v844_v29 = vpack.c.bf16 %v94_v19, %v93_v18  ;;  %v174_v45 = vrot.slane %v1193_v15, %v173_v39  ;;  %v1090_v52 = vmov 0.0  }
  0x5e   :  { %837 = vmatpush3.bf16.msra.mxu0 %v836_v0  ;;  %v143_v27 = vld [vmem:[#allocation5 + $0x1f0] sm:$0xff]  ;;  %v144_v28 = vld [vmem:[#allocation5 + $0x1f8] sm:$0xff]  ;;  %252 = vmatprep.mubr.f32.mxu0 %v170_v21  ;;  %v876_v30 = vpack.c.bf16 %v126_v23, %v125_v20  ;;  %v846_v31 = vpack.c.bf16 %v112_v25, %v111_v24  ;;  %v145_v41 = vld [vmem:[#allocation5 + $0x200] sm:$0xff] }
  0x5f   :  { %839 = vmatprep.subr.bf16.mxu0 %v838_v2  ;;  %322 = vmatprep.mubr.f32.mxu1 %v178_v26  ;;  %v95_v32 = vld [vmem:[#allocation5 + $0x70] sm:$0xff]  ;;  %v96_v33 = vld [vmem:[#allocation5 + $0x78] sm:$0xff]  ;;  %v878_v34 = vpack.c.bf16 %v144_v28, %v143_v27  ;;  %v146_v42 = vld [vmem:[#allocation5 + $0x208] sm:$0xff] }
  0x60   :  { %869 = vmatpush3.bf16.msra.mxu1 %v868_v1  ;;  %v127_v35 = vld [vmem:[#allocation5 + $0x170] sm:$0xff]  ;;  %v128_v36 = vld [vmem:[#allocation5 + $0x178] sm:$0xff]  ;;  %v848_v38 = vpack.c.bf16 %v96_v33, %v95_v32  ;;  %v883_v44 = vpack.c.bf16 %v146_v42, %v145_v41  ;;  %v149_v50 = vld [vmem:[#allocation5 + $0x220] sm:$0xff] }
  0x61   :  { %871 = vmatprep.subr.bf16.mxu1 %v870_v7  ;;  %v880_v40 = vpack.c.bf16 %v128_v36, %v127_v35  ;;  %v147_v47 = vld [vmem:[#allocation5 + $0x210] sm:$0xff]  ;;  %v148_v48 = vld [vmem:[#allocation5 + $0x218] sm:$0xff]  ;;  %v150_v51 = vld [vmem:[#allocation5 + $0x228] sm:$0xff]  ;;  %v182_v7 = vrot.slane %v1193_v15, %v181_v5 }
  0x62   :  { %841 = vmatpush3.bf16.msra.mxu0 %v840_v14  ;;  %v886_v49 = vpack.c.bf16 %v148_v48, %v147_v47  ;;  %v889_v53 = vpack.c.bf16 %v150_v51, %v149_v50  ;;  %v151_v54 = vld [vmem:[#allocation5 + $0x230] sm:$0xff]  ;;  %v152_v55 = vld [vmem:[#allocation5 + $0x238] sm:$0xff]  ;;  %v153_v58 = vld [vmem:[#allocation5 + $0x240] sm:$0xff] }
  0x63   :  { %843 = vmatprep.subr.bf16.mxu0 %v842_v17  ;;  %v892_v56 = vpack.c.bf16 %v152_v55, %v151_v54  ;;  %v154_v59 = vld [vmem:[#allocation5 + $0x248] sm:$0xff]  ;;  %v155_v61 = vld [vmem:[#allocation5 + $0x250] sm:$0xff]  ;;  %v156_v62 = vld [vmem:[#allocation5 + $0x258] sm:$0xff] }
  0x64   :  { %873 = vmatpush3.bf16.msra.mxu1 %v872_v16  ;;  %v895_v60 = vpack.c.bf16 %v154_v59, %v153_v58  ;;  %v898_v63 = vpack.c.bf16 %v156_v62, %v155_v61  ;;  %v157_v0 = vld [vmem:[#allocation5 + $0x260] sm:$0xff]  ;;  %v158_v1 = vld [vmem:[#allocation5 + $0x268] sm:$0xff]  ;;  %v159_v3 = vld [vmem:[#allocation5 + $0x270] sm:$0xff] }
  0x65   :  { %875 = vmatprep.subr.bf16.mxu1 %v874_v22  ;;  %v901_v2 = vpack.c.bf16 %v158_v1, %v157_v0  ;;  %v160_v4 = vld [vmem:[#allocation5 + $0x278] sm:$0xff]  ;;  %v399_v8 = vld [vmem:[#allocation7] sm:$0xff]  ;;  %v400_v9 = vld [vmem:[#allocation7 + $0x8] sm:$0xff] }
  0x66   :  { %845 = vmatpush3.bf16.msra.mxu0 %v844_v29  ;;  %v904_v6 = vpack.c.bf16 %v160_v4, %v159_v3  ;;  %v907_v10 = vpack.c.bf16 %v400_v9, %v399_v8  ;;  %v401_v11 = vld [vmem:[#allocation7 + $0x10] sm:$0xff]  ;;  %v402_v12 = vld [vmem:[#allocation7 + $0x18] sm:$0xff]  ;;  %v403_v57 = vld [vmem:[#allocation7 + $0x20] sm:$0xff] }
  0x67   :  { %847 = vmatprep.subr.bf16.mxu0 %v846_v31  ;;  %v910_v13 = vpack.c.bf16 %v402_v12, %v401_v11  ;;  %v404_v14 = vld [vmem:[#allocation7 + $0x28] sm:$0xff]  ;;  %v405_v15 = vld [vmem:[#allocation7 + $0x30] sm:$0xff]  ;;  %v406_v17 = vld [vmem:[#allocation7 + $0x38] sm:$0xff] }
  0x68   :  { %877 = vmatpush3.bf16.msra.mxu1 %v876_v30  ;;  %v913_v16 = vpack.c.bf16 %v404_v14, %v403_v57  ;;  %v916_v18 = vpack.c.bf16 %v406_v17, %v405_v15  ;;  %v407_v19 = vld [vmem:[#allocation7 + $0x40] sm:$0xff]  ;;  %v408_v20 = vld [vmem:[#allocation7 + $0x48] sm:$0xff]  ;;  %v409_v22 = vld [vmem:[#allocation7 + $0x50] sm:$0xff] }
  0x69   :  { %879 = vmatprep.subr.bf16.mxu1 %v878_v34  ;;  %v919_v21 = vpack.c.bf16 %v408_v20, %v407_v19  ;;  %v410_v23 = vld [vmem:[#allocation7 + $0x58] sm:$0xff]  ;;  %v411_v25 = vld [vmem:[#allocation7 + $0x60] sm:$0xff]  ;;  %v412_v26 = vld [vmem:[#allocation7 + $0x68] sm:$0xff] }
  0x6a   :  { %849 = vmatpush3.bf16.msra.mxu0 %v848_v38  ;;  %v922_v24 = vpack.c.bf16 %v410_v23, %v409_v22  ;;  %v925_v27 = vpack.c.bf16 %v412_v26, %v411_v25  ;;  %v413_v28 = vld [vmem:[#allocation7 + $0x70] sm:$0xff]  ;;  %v414_v29 = vld [vmem:[#allocation7 + $0x78] sm:$0xff]  ;;  %v487_v31 = vld [vmem:[#allocation8] sm:$0xff] }
  0x6b   :  { %882 = vmatprep.subr.bf16.mxu0 %v1088_v46  ;;  %v928_v30 = vpack.c.bf16 %v414_v29, %v413_v28  ;;  %v488_v32 = vld [vmem:[#allocation8 + $0x8] sm:$0xff]  ;;  %v489_v33 = vld [vmem:[#allocation8 + $0x10] sm:$0xff]  ;;  %v490_v35 = vld [vmem:[#allocation8 + $0x18] sm:$0xff] }
  0x6c   :  { %881 = vmatpush3.bf16.msra.mxu1 %v880_v40  ;;  %v931_v34 = vpack.c.bf16 %v488_v32, %v487_v31  ;;  %v934_v36 = vpack.c.bf16 %v490_v35, %v489_v33  ;;  %v491_v37 = vld [vmem:[#allocation8 + $0x20] sm:$0xff]  ;;  %v492_v38 = vld [vmem:[#allocation8 + $0x28] sm:$0xff]  ;;  %v493_v40 = vld [vmem:[#allocation8 + $0x30] sm:$0xff] }
  0x6d   :  { %906 = vmatprep.subr.bf16.mxu1 %v1088_v46  ;;  %253 = vmatmul.mubr.f32.vlgmr.msra.gmra.mrb[0].mxu0 %v166_v43  ;;  %v937_v39 = vpack.c.bf16 %v492_v38, %v491_v37  ;;  %v494_v41 = vld [vmem:[#allocation8 + $0x38] sm:$0xff]  ;;  %v495_v43 = vld [vmem:[#allocation8 + $0x40] sm:$0xff]  ;;  %v497_v47 = vld [vmem:[#allocation8 + $0x50] sm:$0xff] }
  0x6e   :  { %884 = vmatpush3.bf16.msra.mxu0 %v883_v44  ;;  %745 = vmatprep.mubr.msk.f32.mxu0 %vm1089_vm0, %v1090_v52  ;;  %v940_v42 = vpack.c.bf16 %v494_v41, %v493_v40  ;;  %v496_v44 = vld [vmem:[#allocation8 + $0x48] sm:$0xff]  ;;  %v498_v48 = vld [vmem:[#allocation8 + $0x58] sm:$0xff]  ;;  %v499_v50 = vld [vmem:[#allocation8 + $0x60] sm:$0xff] }
  0x6f   :  { %323 = vmatmul.mubr.f32.vlgmr.msra.gmra.mrb[0].mxu1 %v174_v45  ;;  %885 = vmatprep.subr.bf16.mxu0 %v1088_v46  ;;  %v943_v45 = vpack.c.bf16 %v496_v44, %v495_v43  ;;  %v500_v51 = vld [vmem:[#allocation8 + $0x68] sm:$0xff]  ;;  %v161_v54 = vld [vmem:[%s1253_s2] sm:$0x1]  ;;  %v501_v3 = vld [vmem:[#allocation8 + $0x70] sm:$0xff] }
  0x70   :  { %780 = vmatprep.mubr.msk.f32.mxu1 %vm1089_vm0, %v1090_v52  ;;  %908 = vmatpush3.bf16.msra.mxu1 %v907_v10  ;;  %v502_v4 = vld [vmem:[#allocation8 + $0x78] sm:$0xff] }
  0x71   :  { %909 = vmatprep.subr.bf16.mxu1 %v1088_v46  ;;  %v415_v5 = vld [vmem:[%s1255_s4] sm:$0x1] }
  0x72   :  { %887 = vmatpush3.bf16.msra.mxu0 %v886_v49  ;;  %v946_v49 = vpack.c.bf16 %v498_v48, %v497_v47  ;;  %v503_v10 = vld [vmem:[%s1257_s6] sm:$0x1] }
  0x73   :  { %888 = vmatprep.subr.bf16.mxu0 %v1088_v46 }
  0x74   :  { %911 = vmatpush3.bf16.msra.mxu1 %v910_v13 }
  0x75   :  { %912 = vmatprep.subr.bf16.mxu1 %v1088_v46 }
  0x76   :  { %890 = vmatpush3.bf16.msra.mxu0 %v889_v53 }
  0x77   :  { %891 = vmatprep.subr.bf16.mxu0 %v1088_v46 }
  0x78   :  { %914 = vmatpush3.bf16.msra.mxu1 %v913_v16 }
  0x79   :  { %915 = vmatprep.subr.bf16.mxu1 %v1088_v46 }
  0x7a   :  { %893 = vmatpush3.bf16.msra.mxu0 %v892_v56 }
  0x7b   :  { %894 = vmatprep.subr.bf16.mxu0 %v1088_v46 }
  0x7c   :  { %917 = vmatpush3.bf16.msra.mxu1 %v916_v18 }
  0x7d   :  { %918 = vmatprep.subr.bf16.mxu1 %v1088_v46 }
  0x7e   :  { %896 = vmatpush3.bf16.msra.mxu0 %v895_v60 }
  0x7f   :  { %897 = vmatprep.subr.bf16.mxu0 %v1088_v46 }
  0x80   :  { %920 = vmatpush3.bf16.msra.mxu1 %v919_v21 }
  0x81   :  { %921 = vmatprep.subr.bf16.mxu1 %v1088_v46 }
  0x82   :  { %899 = vmatpush3.bf16.msra.mxu0 %v898_v63 }
  0x83   :  { %900 = vmatprep.subr.bf16.mxu0 %v1088_v46 }
  0x84   :  { %923 = vmatpush3.bf16.msra.mxu1 %v922_v24 }
  0x85   :  { %924 = vmatprep.subr.bf16.mxu1 %v1088_v46 }
  0x86   :  { %902 = vmatpush3.bf16.msra.mxu0 %v901_v2 }
  0x87   :  { %903 = vmatprep.subr.bf16.mxu0 %v1088_v46 }
  0x88   :  { %926 = vmatpush3.bf16.msra.mxu1 %v925_v27 }
  0x89   :  { %927 = vmatprep.subr.bf16.mxu1 %v1088_v46 }
  0x8a   :  { %905 = vmatpush3.bf16.msra.mxu0 %v904_v6 }
  0x8b   :  { %930 = vmatprep.subr.bf16.mxu0 %v1088_v46 }
  0x8c   :  { %929 = vmatpush3.bf16.msra.mxu1 %v928_v30 }
  0x8d   :  { %746 = vmatmul.mubr.f32.vlgmr.msra.gmra.mrb[2].mxu0 %v182_v7 }
  0x8e   :  { %815 = vmatprep.mubr.msk.f32.mxu0 %vm1089_vm0, %v1090_v52  ;;  %932 = vmatpush3.bf16.msra.mxu0 %v931_v34  ;;  %v949_v52 = vpack.c.bf16 %v500_v51, %v499_v50 }
  0x8f   :  { %933 = vmatprep.subr.bf16.mxu0 %v1088_v46 }
  0x92   :  { %935 = vmatpush3.bf16.msra.mxu0 %v934_v36 }
  0x93   :  { %936 = vmatprep.subr.bf16.mxu0 %v1088_v46 }
  0x96   :  { %938 = vmatpush3.bf16.msra.mxu0 %v937_v39 }
  0x97   :  { %939 = vmatprep.subr.bf16.mxu0 %v1088_v46 }
  0x9a   :  { %941 = vmatpush3.bf16.msra.mxu0 %v940_v42 }
  0x9b   :  { %942 = vmatprep.subr.bf16.mxu0 %v1088_v46 }
  0x9e   :  { %944 = vmatpush3.bf16.msra.mxu0 %v943_v45 }
  0x9f   :  { %945 = vmatprep.subr.bf16.mxu0 %v1088_v46 }
  0xa2   :  { %947 = vmatpush3.bf16.msra.mxu0 %v946_v49 }
  0xa3   :  { %948 = vmatprep.subr.bf16.mxu0 %v1088_v46 }
  0xa6   :  { %950 = vmatpush3.bf16.msra.mxu0 %v949_v52 }
  0xa7   :  { %951 = vmatprep.subr.bf16.mxu0 %v1088_v46  ;;  %v952_v46 = vpack.c.bf16 %v502_v4, %v501_v3 }
  0xaa   :  { %953 = vmatpush3.bf16.msra.mxu0 %v952_v46 }
 0x140   :  { %v624_v53 = vpop.f32.mrb[0].mxu0 }
 0x141   :  { %v625_v55 = vpop.f32.mrb[1].mxu0 }
 0x142   :  { %v659_v56 = vpop.f32.mrb[0].mxu1  ;;  %v626_v58 = vadd.f32 %v625_v55, %v624_v53 }
 0x143   :  { %v660_v59 = vpop.f32.mrb[1].mxu1 }
 0x144   :  { %v661_v60 = vadd.f32 %v660_v59, %v659_v56  ;;  %v255_v61 = vadd.f32 %v626_v58, %v161_v54 }
 0x146   :  { %v325_v62 = vadd.f32 %v661_v60, %v255_v61 }
 0x160   :  { %v394_v63 = vpop.f32.mrb[2].mxu0 }
 0x161   :  { %v395_v0 = vadd.f32 %v394_v63, %v325_v62  ;;  %v747_v1 = vpop.f32.mrb[3].mxu0 }
 0x163   :  { %v398_v2 = vmax.f32 %v395_v0, 0.0 }
 0x165   :  { %781 = vmatmul.mubr.f32.vlgmr.msra.gmra.mrb[2].mxu1 %v398_v2 }
 0x238   :  { %v482_v6 = vpop.f32.mrb[2].mxu1 }
 0x239   :  { %v483_v7 = vadd.f32 %v482_v6, %v415_v5  ;;  %v782_v8 = vpop.f32.mrb[3].mxu1 }
 0x23b   :  { %v486_v9 = vmax.f32 %v483_v7, 0.0 }
 0x23d   :  { %816 = vmatmul.mubr.f32.vlgmr.msra.gmra.mrb[4].mxu0 %v486_v9 }
 0x310   :  { %v570_v11 = vpop.f32.mrb[4].mxu0 }
 0x311   :  { %v571_v12 = vadd.f32 %v570_v11, %v503_v10  ;;  %v817_v13 = vpop.f32.mrb[5].mxu0 }
 0x313   :  { %574 = vst [vmem:[#allocation10] sm:$0x1] %v571_v12 }
 0x314   :  { %1063 = shalt.err (!%p1060_p8)
}
 0x315   :  { %s1064_s13 = scalar_lea.hbm %s1258_s7, 16 }
 0x316   :  { %p1065_p9 = scmp.ne.s32.totalorder %s1258_s7, %s1064_s13  ;;  %p1068_p10 = scmp.lt.u32.totalorder %s1064_s13, %s1258_s7 }
 0x318   :  { %p1070_p11 = pnand %p1068_p10, %p1065_p9 }
 0x31a   :  { %1073 = shalt.err (!%p1070_p11)
}
 0x31b   :  { %584 = dma.vmem_to_hbm [thread:$0]  %s582_s30, 16, %s1258_s7, [#allocation4]  }
 0x31c   :  { %1080 = dma.done.wait [#allocation4], 16  }
 0x31d   :  { %1081 = vsyncadd [#allocation4], 4294967280 }
 0x31e   :  { %588 = vsyncpa [#allocation3], 1 }
 0x31f   :  { %589 = vsyncpa [#allocation6], 1 }
 0x320   :  { %590 = vsyncpa [#allocation9], 1 }
 0x321   :  { %591 = vsyncpa [#allocation4], 1 }

</bundles_post_ra>
